<compile_context>
chip_gen: v5e
topology: v5e:2x2
jax: 0.10.0
libtpu: 0.0.40
codegen_flags: <defaults>
</compile_context>

<pallas_src>
import functools
from typing import NamedTuple

import jax
import jax.numpy as jnp
from jax.experimental import pallas as pl
from jax.experimental.pallas import tpu as pltpu


EPS = 1e-6

# Double-buffered tile footprint budget (bytes). 32 MiB fits comfortably inside
# v7x's 64 MiB physical VMEM and is far above the 1-2 MiB/step needed to reach
# ~85%+ of the HBM roofline on any generation.
_VMEM_TILE_BUDGET = 32 * 1024 * 1024


class Normal(NamedTuple):
    """Stand-in for torch.distributions.Normal(*params)."""
    loc: jax.Array
    scale: jax.Array


def _softplus(z):
    # Numerically stable softplus matching torch.nn.Softplus (beta=1).
    return jnp.maximum(z, 0.0) + jnp.log1p(jnp.exp(-jnp.abs(z)))


def _prob_head_kernel(x_ref, w_ref, b_ref, mean_ref, std_ref, *, c_out):
    """Fused 1x1-conv head + transform_to_distribution_params (2-param case).

    x_ref:    (C_in, TL)       input tile for one batch element
    w_ref:    (2*C_out, C_in)  fused [mean; std] weights
    b_ref:    (2*C_out, 1)     fused [mean; std] bias
    mean_ref: (C_out, TL)
    std_ref:  (C_out, TL)
    """
    y = jnp.dot(w_ref[...], x_ref[...],
                preferred_element_type=jnp.float32) + b_ref[...]
    mean = y[:c_out, :]          # static sublane slice (XLU, otherwise idle)
    std_raw = y[c_out:, :]
    mean_ref[...] = mean.astype(mean_ref.dtype)
    std_ref[...] = (_softplus(std_raw) + EPS).astype(std_ref.dtype)


def _choose_tile_l(l, c_in, c_out, x_bytes, out_bytes,
                   budget=_VMEM_TILE_BUDGET):
    """Pick the spatial tile from a VMEM budget (double-buffered footprint)."""
    per_elem = 2 * c_in * x_bytes + 2 * 2 * c_out * out_bytes
    max_tile = budget // per_elem
    if l <= max_tile:
        return l
    tile = max((max_tile // 512) * 512, 512)
    # Prefer a tile that divides l so the last block is not a masked partial.
    t = tile
    while t >= 512:
        if l % t == 0:
            return t
        t -= 512
    return min(tile, l)


@functools.partial(jax.jit, static_argnames=("c_out", "tile_l", "out_dtype"))
def _prob_head_pallas(x_ncl, w_cat, b_cat, *, c_out, tile_l,
                      out_dtype=jnp.float32):
    n, c_in, l = x_ncl.shape
    num_l_tiles = pl.cdiv(l, tile_l)
    # Larger parallel axis first -> balanced megacore sharding on v7x even
    # when N is 1-2.
    grid = (num_l_tiles, n)

    x_bytes = jnp.dtype(x_ncl.dtype).itemsize
    out_bytes = jnp.dtype(out_dtype).itemsize

    # Actual double-buffered footprint (no double counting): x tile + two
    # output tiles, each double-buffered, plus resident (double-buffered)
    # weights/bias blocks.
    tile_footprint = (
        2 * c_in * tile_l * x_bytes
        + 2 * 2 * c_out * tile_l * out_bytes
        + 2 * (2 * c_out * c_in + 2 * c_out) * w_cat.dtype.itemsize
    )
    vmem_limit = None
    if tile_footprint > 16 * 1024 * 1024:
        # +15% headroom, capped at 48 MiB (safe on v7x's 64 MiB physical VMEM
        # and trivially within v5e/v6e's 128 MiB).
        vmem_limit = int(min(tile_footprint * 1.15, 48 * 1024 * 1024))

    cost = pl.CostEstimate(
        flops=2 * n * l * c_in * (2 * c_out),
        transcendentals=2 * n * l * c_out,  # exp + log1p per std element
        bytes_accessed=(n * c_in * l * x_bytes
                        + 2 * n * c_out * l * out_bytes
                        + (2 * c_out * c_in + 2 * c_out) * 4),
    )

    mean, std = pl.pallas_call(
        functools.partial(_prob_head_kernel, c_out=c_out),
        out_shape=(
            jax.ShapeDtypeStruct((n, c_out, l), out_dtype),
            jax.ShapeDtypeStruct((n, c_out, l), out_dtype),
        ),
        grid_spec=pltpu.PrefetchScalarGridSpec(
            num_scalar_prefetch=0,
            grid=grid,
            in_specs=[
                pl.BlockSpec((None, c_in, tile_l), lambda j, b: (b, 0, j)),
                pl.BlockSpec((2 * c_out, c_in), lambda j, b: (0, 0)),
                pl.BlockSpec((2 * c_out, 1), lambda j, b: (0, 0)),
            ],
            out_specs=[
                pl.BlockSpec((None, c_out, tile_l), lambda j, b: (b, 0, j)),
                pl.BlockSpec((None, c_out, tile_l), lambda j, b: (b, 0, j)),
            ],
        ),
        compiler_params=pltpu.CompilerParams(
            dimension_semantics=("parallel", "parallel"),
            vmem_limit_bytes=vmem_limit,
        ),
        cost_estimate=cost,
    )(x_ncl, w_cat, b_cat)
    return mean, std


class ProbabilisticWrapperPallas:
    """JAX/Pallas equivalent of ProbabilisticWrapper(Normal, conv1x1_head)."""

    def __init__(self, c_in, c_out, key, out_dtype=jnp.float32):
        kw, kb = jax.random.split(key, 2)
        # The wrapped model's 1x1 conv parameters, stored fused:
        #   rows [0:c_out)        -> mean branch
        #   rows [c_out:2*c_out)  -> std branch (pre-softplus)
        self.w_cat = jax.random.normal(kw, (2 * c_out, c_in), jnp.float32) * 0.1
        self.b_cat = jax.random.normal(kb, (2 * c_out, 1), jnp.float32) * 0.1
        self.c_in = c_in
        self.c_out = c_out
        self.out_dtype = out_dtype  # set to jnp.bfloat16 to halve write traffic

    def __call__(self, x, mask=None):
        # TODO(synk): `mask` boolean fancy-indexing (p[mask]) is a
        # data-dependent gather with dynamic output size; only the mask=None
        # path is kernelized.
        assert mask is None
        n, c, h, w_sp = x.shape  # NCHW, as in PyTorch
        l = h * w_sp
        # NCHW -> (N, C_in, L): pure reshape of the trailing dims, no transpose.
        x_ncl = x.reshape(n, c, l)
        tile_l = _choose_tile_l(
            l, self.c_in, self.c_out,
            x_bytes=jnp.dtype(x.dtype).itemsize,
            out_bytes=jnp.dtype(self.out_dtype).itemsize,
        )
        mean_ncl, std_ncl = _prob_head_pallas(
            x_ncl, self.w_cat, self.b_cat,
            c_out=self.c_out, tile_l=tile_l, out_dtype=self.out_dtype,
        )
        # (N, C_out, L) -> NCHW: again a pure reshape.
        mean = mean_ncl.reshape(n, self.c_out, h, w_sp)
        std = std_ncl.reshape(n, self.c_out, h, w_sp)
        # transform_to_distribution_params (len(params)==2) -> Normal(mean, std)
        return Normal(loc=mean, scale=std)


if __name__ == "__main__":
    key = jax.random.PRNGKey(0)
    k_x, k_m = jax.random.split(key)

    N, C_IN, H, W = 2, 4, 16, 16
    C_OUT = 4
    x = jax.random.normal(k_x, (N, C_IN, H, W), jnp.float32)

    wrapper = ProbabilisticWrapperPallas(C_IN, C_OUT, k_m)
    dist = wrapper(x)
    jax.block_until_ready(dist.loc)
    jax.block_until_ready(dist.scale)

    # Reference check in plain JAX (NCHW-native math).
    x_ncl = x.reshape(N, C_IN, H * W)
    y_ref = jnp.einsum("oc,ncl->nol", wrapper.w_cat, x_ncl) + wrapper.b_cat[None]
    mean_ref = y_ref[:, :C_OUT].reshape(N, C_OUT, H, W)
    std_ref = (jax.nn.softplus(y_ref[:, C_OUT:]) + EPS).reshape(N, C_OUT, H, W)

    assert dist.loc.shape == (N, C_OUT, H, W)
    assert dist.scale.shape == (N, C_OUT, H, W)
    assert jnp.allclose(dist.loc, mean_ref, atol=1e-5)
    assert jnp.allclose(dist.scale, std_ref, atol=1e-5)
    assert bool(jnp.all(dist.scale > 0.0))

    print("KERNEL_OK")
</pallas_src>

<mosaic_0001>
module attributes {stable_mosaic.version = 11 : i64} {
  func.func @_prob_head_kernel(%arg0: i32, %arg1: i32, %arg2: memref<1x4x256xf32, #tpu.memory_space<vmem>>, %arg3: memref<8x4xf32, #tpu.memory_space<vmem>>, %arg4: memref<8x1xf32, #tpu.memory_space<vmem>>, %arg5: memref<1x4x256xf32, #tpu.memory_space<vmem>>, %arg6: memref<1x4x256xf32, #tpu.memory_space<vmem>>) attributes {dimension_semantics = [#tpu.dimension_semantics<parallel>, #tpu.dimension_semantics<parallel>], iteration_bounds = array<i64: 1, 2>, scalar_prefetch = 0 : i64, scratch_operands = 0 : i64, tpu.core_type = #tpu.core_type<tc>, window_params = [{transform_indices = @transform_0, window_bounds = array<i64: 1, 4, 256>}, {pipeline_mode = #tpu.pipeline_mode<synchronous>, transform_indices = @transform_1, window_bounds = array<i64: 8, 4>}, {pipeline_mode = #tpu.pipeline_mode<synchronous>, transform_indices = @transform_2, window_bounds = array<i64: 8, 1>}, {transform_indices = @transform_3, window_bounds = array<i64: 1, 4, 256>}, {transform_indices = @transform_4, window_bounds = array<i64: 1, 4, 256>}]} {
    %c0 = arith.constant 0 : index
    %c0_0 = arith.constant 0 : index
    %0 = vector.load %arg3[%c0, %c0_0] : memref<8x4xf32, #tpu.memory_space<vmem>>, vector<8x4xf32>
    %c0_1 = arith.constant 0 : index
    %c0_2 = arith.constant 0 : index
    %c0_3 = arith.constant 0 : index
    %1 = vector.load %arg2[%c0_1, %c0_2, %c0_3] : memref<1x4x256xf32, #tpu.memory_space<vmem>>, vector<1x4x256xf32>
    %2 = vector.shape_cast %1 : vector<1x4x256xf32> to vector<4x256xf32>
    %cst = arith.constant dense<0.000000e+00> : vector<8x256xf32>
    %3 = tpu.matmul %0, %2, %cst {dimension_numbers = #tpu.dot_dimension_numbers<[1], [0], [0], [1], [0, 0, 1, 1], [], []>} : vector<8x4xf32>, vector<4x256xf32>, vector<8x256xf32> -> vector<8x256xf32>
    %c0_4 = arith.constant 0 : index
    %c0_5 = arith.constant 0 : index
    %4 = vector.load %arg4[%c0_4, %c0_5] : memref<8x1xf32, #tpu.memory_space<vmem>>, vector<8x1xf32>
    %5 = vector.broadcast %4 : vector<8x1xf32> to vector<8x256xf32>
    %6 = arith.addf %3, %5 : vector<8x256xf32>
    %7 = vector.extract_strided_slice %6 {offsets = [0, 0], sizes = [4, 256], strides = [1, 1]} : vector<8x256xf32> to vector<4x256xf32>
    %8 = vector.extract_strided_slice %6 {offsets = [4, 0], sizes = [4, 256], strides = [1, 1]} : vector<8x256xf32> to vector<4x256xf32>
    %c0_6 = arith.constant 0 : index
    %c0_7 = arith.constant 0 : index
    %c0_8 = arith.constant 0 : index
    %9 = vector.load %arg5[%c0_6, %c0_7, %c0_8] : memref<1x4x256xf32, #tpu.memory_space<vmem>>, vector<1x4x256xf32>
    %10 = vector.shape_cast %9 : vector<1x4x256xf32> to vector<4x256xf32>
    %11 = vector.shape_cast %7 : vector<4x256xf32> to vector<1x4x256xf32>
    tpu.vector_store %arg5[%c0_6, %c0_7, %c0_8], %11 {strides = array<i32>} : memref<1x4x256xf32, #tpu.memory_space<vmem>>, vector<1x4x256xf32>,
    %cst_9 = arith.constant 0.000000e+00 : f32
    %12 = vector.broadcast %cst_9 : f32 to vector<4x256xf32>
    %13 = arith.maximumf %8, %12 : vector<4x256xf32>
    %14 = math.absf %8 : vector<4x256xf32>
    %cst_10 = arith.constant 0.000000e+00 : f32
    %15 = vector.broadcast %cst_10 : f32 to vector<4x256xf32>
    %16 = arith.subf %15, %14 : vector<4x256xf32>
    %17 = math.exp %16 : vector<4x256xf32>
    %18 = math.log1p %17 : vector<4x256xf32>
    %19 = arith.addf %13, %18 : vector<4x256xf32>
    %cst_11 = arith.constant 9.99999997E-7 : f32
    %20 = vector.broadcast %cst_11 : f32 to vector<4x256xf32>
    %21 = arith.addf %19, %20 : vector<4x256xf32>
    %c0_12 = arith.constant 0 : index
    %c0_13 = arith.constant 0 : index
    %c0_14 = arith.constant 0 : index
    %22 = vector.load %arg6[%c0_12, %c0_13, %c0_14] : memref<1x4x256xf32, #tpu.memory_space<vmem>>, vector<1x4x256xf32>
    %23 = vector.shape_cast %22 : vector<1x4x256xf32> to vector<4x256xf32>
    %24 = vector.shape_cast %21 : vector<4x256xf32> to vector<1x4x256xf32>
    tpu.vector_store %arg6[%c0_12, %c0_13, %c0_14], %24 {strides = array<i32>} : memref<1x4x256xf32, #tpu.memory_space<vmem>>, vector<1x4x256xf32>,
    return
  }
  func.func @transform_0(%arg0: i32, %arg1: i32) -> (i32, i32, i32) {
    %c0_i32 = arith.constant 0 : i32
    %c0_i32_0 = arith.constant 0 : i32
    return %arg1, %c0_i32, %arg0 : i32, i32, i32
  }
  func.func @transform_1(%arg0: i32, %arg1: i32) -> (i32, i32) {
    %c0_i32 = arith.constant 0 : i32
    %c0_i32_0 = arith.constant 0 : i32
    %c0_i32_1 = arith.constant 0 : i32
    return %c0_i32, %c0_i32_0 : i32, i32
  }
  func.func @transform_2(%arg0: i32, %arg1: i32) -> (i32, i32) {
    %c0_i32 = arith.constant 0 : i32
    %c0_i32_0 = arith.constant 0 : i32
    %c0_i32_1 = arith.constant 0 : i32
    return %c0_i32, %c0_i32_0 : i32, i32
  }
  func.func @transform_3(%arg0: i32, %arg1: i32) -> (i32, i32, i32) {
    %c0_i32 = arith.constant 0 : i32
    %c0_i32_0 = arith.constant 0 : i32
    return %arg1, %c0_i32, %arg0 : i32, i32, i32
  }
  func.func @transform_4(%arg0: i32, %arg1: i32) -> (i32, i32, i32) {
    %c0_i32 = arith.constant 0 : i32
    %c0_i32_0 = arith.constant 0 : i32
    return %arg1, %c0_i32, %arg0 : i32, i32, i32
  }
}

</mosaic_0001>

<bundles_post_ra>
// kernel: _prob_head_pallas.1
= control target key start
LH: loop header
LB: loop body
LE: loop exit
PB: predicated region body
PF: predicated region fallthrough
CT: control target
= control target key end

     0   :  { %10 = vsyncpa [#allocation3], 0  ;;  %s865_s0 = inlined_call_operand.vmem [shape: f32[2,4,256], index: 0, kind: input, shape index: {}]   ;;  %s866_s1 = inlined_call_operand.vmem [shape: f32[8,4], index: 1, kind: input, shape index: {}]   ;;  %s867_s2 = inlined_call_operand.vmem [shape: f32[8,1], index: 2, kind: input, shape index: {}]   ;;  %s868_s3 = inlined_call_operand.hbm [shape: f32[2,4,256], index: 3, kind: output, shape index: {0}]   ;;  %s869_s4 = inlined_call_operand.hbm [shape: f32[2,4,256], index: 4, kind: output, shape index: {1}]  }
   0x1   :  { %12 = vsyncpa [#allocation3 + $0x1], 0 }
   0x2   :  { %13 = vsyncpa [#allocation5], 0 }
   0x3   :  { %15 = vsyncpa [#allocation5 + $0x1], 0  ;;  %s733_s15 = smov 0   ;;  %s735_s16 = smov 0  }
   0x4   :  { %s737_s17 = smov 0   ;;  %s739_s18 = smov 0  }
   0x5   :  { %s741_s19 = smov 0   ;;  %s743_s20 = smov 0  }
   0x6 LB: > { %s501_s21 = sadd.s32 4294967295, %s705_s20   ;;  %s502_s22 = sadd.s32 4294967294, %s705_s20   ;;  %s705_s20 = sphi %s743_s20, %s21_s20   ;;  %s701_s19 = sphi %s741_s19, %s876_s19   ;;  %s697_s18 = sphi %s739_s18, %s875_s18   ;;  %s693_s17 = sphi %s737_s17, %s874_s17   ;;  %s689_s16 = sphi %s735_s16, %s873_s16   ;;  %s685_s15 = sphi %s733_s15, %s872_s15  }
   0x7   : > { %s30_s23 = sadd.s32 1, %s701_s19  ;;  %s112_s24 = sadd.s32 1, %s693_s17 }
   0x8   : > { %p31_p0 = scmp.ge.s32.totalorder %s30_s23, 2  ;;  %p122_p1 = scmp.ne.s32.totalorder %s693_s17, %s689_s16 }
   0x9   : > { %p123_p2 = scmp.eq.s32.totalorder %s501_s21, 1  ;;  %p128_p3 = scmp.ne.s32.totalorder %s689_s16, %s685_s15 }
   0xa   : > { %s878_s23 = smov (%p31_p0, %s30_s23), 0  ;;  %p129_p5 = scmp.eq.s32.totalorder %s502_s22, 1 }
   0xb   : > { %p773_p4 = por %p123_p2, %p122_p1  ;;  %s107_s26 = ssub.s32 %s701_s19, %s878_s23 }
   0xc   : > { %p505_p6 = scmp.ge.s32.totalorder %s705_s20, 1  ;;  %p110_p7 = scmp.eq.s32.totalorder %s107_s26, 0 }
   0xd   : > { %p780_p8 = por %p129_p5, %p128_p3  ;;  %p194_p9 = scmp.lt.s32.totalorder %s705_s20, 3 }
   0xe   : > { %s786_s28 = scalar_select %p110_p7, %s693_s17, %s112_s24  }
   0xf   : > { %p195_p10 = pnand %p505_p6, %p194_p9 }
  0x10   : > { %p230_p11 = scmp.lt.s32.totalorder (!%p195_p10), %s697_s18, 1  ;;  %s802_s12 = sand.u32 (!%p195_p10), 1, %s689_s16  }
  0x11   : > { %198 = sbr.rel (%p195_p10) target bundleno = 206 (0xce), region = 32  ;;  %s523_s13 = sshll.u32 (!%p195_p10), %s697_s18, 3 }
  0x12   : > { %s506_s14 = sshll.u32 (!%p195_p10), %s802_s12, 3  ;;  %s367_s24 = scalar_lea.hbm (!%p195_p10), %s868_s3, %s523_s13 }
  0x13   : > { %s221_s26 = scalar_lea.vmem (!%p195_p10), [#allocation2], %s506_s14  ;;  %s371_s30 = sshll.u32 (!%p195_p10), %s367_s24, 4  ;;  %s372_s30 = int_to_ptr.hbm [resolvable:$true] %s371_s30 }
  0x14   : > { %s369_s29 = sshll.u32 (!%p195_p10), %s221_s26, 4  ;;  %s615_s10 = scalar_lea.hbm (!%p195_p10), %s868_s3, 16  ;;  %s370_s29 = int_to_ptr.vmem [resolvable:$true] %s369_s29 }
  0x16   : > { %v243_v0 = vld [vmem:[%s867_s2] sm:$0xff]  ;;  %v707_v1 = vmov 0   ;;  %s231_s5 = scalar_select %p230_p11, %s697_s18, 1  ;;  %vm257_vm0 = vcmask 1043456   ;;  %vm253_vm1 = vcmask 31744  }
  0x17   : > { %586 = vset.pattern.permute.xlu0 %v707_v1  ;;  %v241_v3 = vld [vmem:[%s866_s1] sm:$0xff] }
  0x18   : > { %246 = vperm.xlu0 %586, %v243_v0   ;;  %s522_s6 = sshll.u32 %s231_s5, 3  ;;  %s349_s5 = scalar_lea.sflag [#allocation3], %s802_s12 }
  0x19   : > { %s237_s9 = scalar_lea.vmem %s865_s0, %s522_s6  ;;  %s609_s6 = sshra.s32 %s372_s30, 4  ;;  %s610_s6 = int_to_ptr.hbm [resolvable:$true] %s609_s6 }
  0x1a   : > { %v242_v2 = vld [vmem:[%s237_s9] sm:$0xff]  ;;  %s611_s7 = scalar_lea.hbm %s610_s6, 8  ;;  %p616_p1 = scmp.lt.s32.totalorder %s610_s6, %s868_s3 }
  0x1b   : > { %250 = vst [vmem:[#allocation1] ss:$2 sm:$0xff] %v242_v2  ;;  %p612_p12 = scmp.ne.s32.totalorder %s610_s6, %s611_s7  ;;  %p617_p2 = scmp.lt.s32.totalorder %s615_s10, %s611_s7 }
  0x1d   : > { %p613_p13 = pnand %p612_p12, %p773_p4  ;;  %p618_p3 = por %p617_p2, %p616_p1 }
  0x1f   : > { %p614_p0 = pneg %p613_p13 }
  0x21   : > { %p619_p5 = pnand %p618_p3, %p614_p0 }
  0x22   : > { %v251_v4 = vld.sshfl [vmem:[#allocation1] sm:$0xff pattern:$0x75316420]  ;;  %v252_v5 = vld.sshfl [vmem:[#allocation1 + $0x8] sm:$0xff pattern:$0x75316420] }
  0x23   : > { %510 = vmatpush.msk.msra.mxu0 %vm257_vm0, %v251_v4  ;;  %512 = vmatpush.msk.msra.mxu1 %vm257_vm0, %v252_v5 }
  0x24   : > { %511 = vmatmul.msk.f32.vlgmr.msra.gmra.mxu0 %vm253_vm1, %v241_v3  ;;  %513 = vmatmul.msk.f32.vlgmr.msra.gmra.mxu1 %vm253_vm1, %v241_v3 }
  0x8a   : > { %v247_v6 = vpop.permute.xlu0 %246 }
  0xa1   : > { %v279_v7 = vpop.f32.mrf.mxu0  ;;  %v299_v8 = vpop.f32.mrf.mxu1 }
  0xa2   : > { %v280_v9 = vadd.f32 %v279_v7, %v247_v6  ;;  %v300_v10 = vadd.f32 %v299_v8, %v247_v6 }
  0xa4   : > { %v310_v11 = vand.u32 2147483647, %v280_v9  ;;  %v304_v12 = vrot.slane %v300_v10, 4  ;;  %v311_v13 = vand.u32 2147483647, %v300_v10 }
  0xa6   : > { %v312_v14 = vsub.f32 0.0, %v310_v11  ;;  %v305_v15 = vsel %vm257_vm0, %v280_v9, %v304_v12  ;;  %v313_v16 = vsub.f32 0.0, %v311_v13 }
  0xa7   : > { %307 = vst [vmem:[%s221_s26] sm:$0xff] %v305_v15 }
  0xa8   : > { %v314_v17 = vmul.f32 1.442695, %v312_v14 }
  0xa9   : > { %622 = shalt.err (!%p619_p5)
}
  0xaa   : > { %525 = dma.vmem_to_hbm [thread:$0]  (%p773_p4), %s370_s29, 128, %s372_s30, %s349_s5   ;;  %v316_v18 = vmul.f32 1.442695, %v313_v16  ;;  %587 = vpow2.f32 %v314_v17  ;;  %v308_v33 = vmax.f32 %v280_v9, 0.0  ;;  %v309_v37 = vmax.f32 %v300_v10, 0.0 }
  0xab   : > { %s384_s26 = scalar_lea.hbm %s869_s4, %s523_s13  ;;  %s228_s29 = scalar_lea.vmem [#allocation4], %s506_s14 }
  0xac   : > { %589 = vpow2.f32 %v316_v18  ;;  %s386_s30 = sshll.u32 %s228_s29, 4  ;;  %s388_s5 = sshll.u32 %s384_s26, 4  ;;  %s387_s30 = int_to_ptr.vmem [resolvable:$true] %s386_s30  ;;  %s389_s5 = int_to_ptr.hbm [resolvable:$true] %s388_s5 }
  0xad   : > { %s354_s6 = scalar_lea.sflag [#allocation5], %s802_s12  ;;  %s637_s7 = sshra.s32 %s389_s5, 4  ;;  %s638_s7 = int_to_ptr.hbm [resolvable:$true] %s637_s7 }
  0xae   : > { %s639_s8 = scalar_lea.hbm %s638_s7, 8  ;;  %s643_s13 = scalar_lea.hbm %s869_s4, 16 }
  0xaf   : > { %p640_p6 = scmp.ne.s32.totalorder %s638_s7, %s639_s8  ;;  %p644_p10 = scmp.lt.s32.totalorder %s638_s7, %s869_s4 }
  0xb0   : > { %v588_v19 = vpop.eup %587  ;;  %p645_p11 = scmp.lt.s32.totalorder %s643_s13, %s639_s8 }
  0xb1   : > { %v318_v21 = vadd.f32 1.0, %v588_v19  ;;  %v321_v22 = vmul.f32 -0.5, %v588_v19  ;;  %v324_v26 = vand.u32 2147483647, %v588_v19  ;;  %p641_p7 = pnand %p640_p6, %p773_p4 }
  0xb2   : > { %v590_v20 = vpop.eup %589  ;;  %p646_p12 = por %p645_p11, %p644_p10 }
  0xb3   : > { %v327_v23 = vadd.f32 1.0, %v590_v20  ;;  %591 = vlog2.f32 %v318_v21  ;;  %v330_v24 = vmul.f32 -0.5, %v590_v20  ;;  %v322_v25 = vadd.f32 1.0, %v321_v22  ;;  %p642_p9 = pneg %p641_p7 }
  0xb4   : > { %v333_v28 = vand.u32 2147483647, %v590_v20  ;;  %vm325_vm2 = vcmp.lt.f32.partialorder %v324_v26, 0.0004427343 }
  0xb5   : > { %593 = vlog2.f32 %v327_v23  ;;  %v331_v27 = vadd.f32 1.0, %v330_v24  ;;  %v323_v32 = vmul.f32 %v588_v19, %v322_v25  ;;  %p647_p13 = pnand %p646_p12, %p642_p9 }
  0xb6   : > { %vm334_vm3 = vcmp.lt.f32.partialorder %v333_v28, 0.0004427343 }
  0xb7   : > { %v332_v35 = vmul.f32 %v590_v20, %v331_v27 }
  0xb9   : > { %v592_v29 = vpop.eup %591 }
  0xba   : > { %v320_v31 = vmul.f32 0.6931472, %v592_v29 }
  0xbb   : > { %v594_v30 = vpop.eup %593 }
  0xbc   : > { %v329_v34 = vmul.f32 0.6931472, %v594_v30  ;;  %v326_v36 = vsel %vm325_vm2, %v323_v32, %v320_v31 }
  0xbd   : > { %v336_v38 = vadd.f32 %v326_v36, %v308_v33 }
  0xbe   : > { %v335_v39 = vsel %vm334_vm3, %v332_v35, %v329_v34 }
  0xbf   : > { %v337_v40 = vadd.f32 %v335_v39, %v309_v37  ;;  %v338_v41 = vadd.f32 1e-06, %v336_v38 }
  0xc1   : > { %v339_v42 = vadd.f32 1e-06, %v337_v40  ;;  %342 = vst.sshfl [vmem:[#allocation1] sm:$0xff pattern:$0x75316420] %v338_v41 }
  0xc3   : > { %343 = vst.sshfl [vmem:[#allocation1 + $0x8] sm:$0xff pattern:$0x75316420] %v339_v42 }
  0xca   : > { %v345_v43 = vld [vmem:[#allocation1 + $0x1] ss:$2 sm:$0xff] }
  0xcb   : > { %347 = vst [vmem:[%s228_s29] sm:$0xff] %v345_v43 }
  0xcc   : > { %650 = shalt.err (!%p647_p13)
}
  0xcd   : > { %526 = dma.vmem_to_hbm [thread:$0]  (%p773_p4), %s387_s30, 128, %s389_s5, %s354_s6  }
  0xce PF: > { %p536_p0 = scmp.ge.s32.totalorder %s705_s20, 2  ;;  %s400_s12 = sand.u32 1, %s685_s15  }
  0xcf   : > { %s401_s11 = scalar_lea.sflag [#allocation3], %s400_s12 }
  0xd0   : > { %p530_p1 = pnand %p536_p0, %p780_p8 }
  0xd2   : > { %p531_p2 = pneg %p530_p1 }
  0xd4   : > { %676 = dma.done.wait (%p531_p2), %s401_s11, 128  }
  0xd5   : > { %678 = vsyncadd (%p531_p2), %s401_s11, 4294967168  ;;  %s411_s21 = scalar_lea.sflag [#allocation5], %s400_s12 }
  0xd6   : > { %680 = dma.done.wait (%p531_p2), %s411_s21, 128  }
  0xd7   : > { %682 = vsyncadd (%p531_p2), %s411_s21, 4294967168  ;;  %s21_s20 = sadd.s32 1, %s705_s20   ;;  %s872_s15 = smov %s689_s16 }
  0xd8   : > { %p18_p3 = scmp.ge.s32.totalorder %s21_s20, 4   ;;  %s873_s16 = smov %s693_s17 }
  0xd9   : > { %s874_s17 = smov %s786_s28  ;;  %s875_s18 = smov %s701_s19 }
  0xda   : > { %s876_s19 = smov %s878_s23  ;;  %20 = sbr.rel (!%p18_p3) target bundleno = 6 (0x6), region = 85 }
  0xdf   :  { %417 = vsyncpa [#allocation3], 1 }
  0xe0   :  { %419 = vsyncpa [#allocation3 + $0x1], 1 }
  0xe1   :  { %420 = vsyncpa [#allocation5], 1 }
  0xe2   :  { %422 = vsyncpa [#allocation5 + $0x1], 1 }

</bundles_post_ra>
